<compile_context>
chip_gen: v7x
topology: tpu7x:2x2x1
jax: 0.10.0
libtpu: 0.0.40
codegen_flags: <defaults>
</compile_context>

<pallas_src>
import jax
import jax.numpy as jnp
from jax.experimental import pallas as pl
from jax.experimental.pallas import tpu as pltpu


def _round_up(a, b):
    return -(-a // b) * b


def _emb_linear_kernel(x_ref, w_ref, b_ref, o_ref, acc_ref):
    # x_ref: (tm, tk)  w_ref: (tk, tn)  b_ref: (1, tn)
    # o_ref: (tm, tn)  acc_ref: (tm, tn) f32 scratch
    k = pl.program_id(2)

    @pl.when(k == 0)
    def _init():
        # Fold the bias into the accumulator init (saves the epilogue add).
        acc_ref[...] = jnp.broadcast_to(
            b_ref[...].astype(jnp.float32), acc_ref.shape)

    acc_ref[...] += jnp.dot(x_ref[...], w_ref[...],
                            preferred_element_type=jnp.float32)

    @pl.when(k == pl.num_programs(2) - 1)
    def _finalize():
        o_ref[...] = acc_ref[...].astype(o_ref.dtype)


def _default_tiles(N, K, Nout):
    # Reduction tile: take all of K in a single step whenever it is modest
    # (full-dim block is legal for ANY K, so K=32 is not padded to 128).
    # Only very large K is tiled, 128-aligned.
    tk = K if K <= 1024 else 1024
    # Column tile: whole Nout when small (full-dim block satisfies the lane
    # rule), else 512 -- a multiple of 256 for the v6e/v7x 2x256x256 MXU and
    # of 128 for the v5e MXU.
    tn = Nout if Nout <= 512 else 512
    # Row tile: whole N when small, else 512.
    tm = N if N <= 512 else 512
    # v7x has two TensorCores: if the natural grid would be 1x1 on the
    # parallel axes, split the row axis in two (keeping tm a multiple of 8).
    if N <= 512 and Nout <= 512 and N >= 16 and N % 16 == 0:
        tm = N // 2
    return tm, tn, tk


def emb_linear(x, weight_t, bias, *, tm=None, tn=None, tk=None):
    """y = x @ weight_t + bias  (nn.Linear with weight pre-transposed to (in, out)).

    x:        (N, K)       flattened token embeddings
    weight_t: (K, Nout)    transposed once at setup from PyTorch's (Nout, K)
    bias:     (Nout,)
    """
    N, K = x.shape
    K2, Nout = weight_t.shape
    assert K == K2 and bias.shape == (Nout,)

    dtm, dtn, dtk = _default_tiles(N, K, Nout)
    tm = dtm if tm is None else tm
    tn = dtn if tn is None else tn
    tk = dtk if tk is None else tk

    # (8, 128) block-shape rule: full-dim blocks are always legal.
    assert tm == N or tm % 8 == 0
    assert tn == Nout or tn % 128 == 0
    assert tk == K or tk % 128 == 0

    # The reduction axis must be covered exactly: zero-pad K only when it is
    # tiled and ragged (garbage in a partial K tile would corrupt real
    # outputs).  Ragged N / Nout edges are left to Pallas partial tiles: the
    # garbage rows/cols fall outside the (N, Nout) output and are never
    # written back, so no jnp.pad HBM copies of x / W are needed.
    K_pad = K if tk == K else _round_up(K, tk)
    x_p = x if K_pad == K else jnp.pad(x, ((0, 0), (0, K_pad - K)))
    w_p = weight_t if K_pad == K else jnp.pad(weight_t, ((0, K_pad - K), (0, 0)))
    b2 = bias.reshape(1, Nout)

    grid = (pl.cdiv(N, tm), pl.cdiv(Nout, tn), K_pad // tk)
    gm, gn, gk = grid

    xsz = jnp.dtype(x.dtype).itemsize
    wsz = jnp.dtype(weight_t.dtype).itemsize
    bsz = jnp.dtype(bias.dtype).itemsize
    osz = xsz
    # Include the re-streaming factors: x is re-read per column-tile pass and
    # W per row-tile pass.
    cost = pl.CostEstimate(
        flops=2 * (gm * tm) * K_pad * (gn * tn),
        transcendentals=0,
        bytes_accessed=(x_p.size * xsz) * gn
                       + (w_p.size * wsz) * gm
                       + b2.size * bsz * gm * gk
                       + N * Nout * osz,
    )

    # Scoped-VMEM budget: double-buffered x / W / bias / out tiles plus the
    # f32 accumulator, with headroom.  Defaults (512 x 512 x 1024, f32) come
    # to ~11 MiB -> limit ~32 MiB, safe on v5e/v6e/v7x.
    footprint = (2 * (tm * tk * xsz + tk * tn * wsz + tn * bsz)
                 + 2 * tm * tn * osz + tm * tn * 4)
    vmem_limit = max(int(footprint * 1.25) + (2 << 20), 32 << 20)

    return pl.pallas_call(
        _emb_linear_kernel,
        out_shape=jax.ShapeDtypeStruct((N, Nout), x.dtype),
        grid_spec=pltpu.PrefetchScalarGridSpec(
            num_scalar_prefetch=0,
            grid=grid,
            in_specs=[
                pl.BlockSpec((tm, tk), lambda i, j, k: (i, k)),   # x row/K tile
                pl.BlockSpec((tk, tn), lambda i, j, k: (k, j)),   # W K/col tile
                pl.BlockSpec((1, tn), lambda i, j, k: (0, j)),    # bias col tile
            ],
            out_specs=pl.BlockSpec((tm, tn), lambda i, j, k: (i, j)),
            scratch_shapes=[pltpu.VMEM((tm, tn), jnp.float32)],
        ),
        compiler_params=pltpu.CompilerParams(
            dimension_semantics=("parallel", "parallel", "arbitrary"),
            vmem_limit_bytes=vmem_limit,
        ),
        cost_estimate=cost,
    )(x_p, w_p, b2)


def prepare_emb_linear_params(weight_pt, bias):
    """Hoist the (out, in) -> (in, out) transpose out of the per-call path:
    done once at module setup, like registering a transposed parameter."""
    # TODO(synk): optionally cast weight/x to bf16 for ~2-4x MXU throughput
    # (accumulation stays f32); left in f32 to preserve the module's numerics.
    return jnp.asarray(weight_pt).T, jnp.asarray(bias)


def emb_linear_apply(x_emb, weight_t, bias, *, min_pallas_rows=0):
    """Apply y = x @ W^T + b to one embedding tensor (any leading batch dims)."""
    in_size = x_emb.shape[-1]
    out_size = weight_t.shape[1]
    rows = x_emb.reshape(-1, in_size)
    if rows.shape[0] < min_pallas_rows:
        # Tiny token counts: a plain XLA dot beats kernel-launch overhead.
        y = rows @ weight_t + bias
    else:
        y = emb_linear(rows, weight_t, bias)
    return y.reshape(x_emb.shape[:-1] + (out_size,))


def emb_linear_forward(embs_tree, weight_t, bias):
    """Mirror of EmbLinear.forward: apply the linear to every embedding tensor
    in the container, i.e. input_.apply(lambda d: self.linear(d))."""
    return jax.tree_util.tree_map(
        lambda d: emb_linear_apply(d, weight_t, bias), embs_tree)


if __name__ == "__main__":
    key = jax.random.PRNGKey(0)
    kx, kw, kb, kx2 = jax.random.split(key, 4)

    # Module-scale shapes: batch=2, seq=8, hidden 32 -> 32.
    batch, seq, input_size, output_size = 2, 8, 32, 32
    bound = 1.0 / (input_size ** 0.5)
    weight_pt = jax.random.uniform(kw, (output_size, input_size), jnp.float32,
                                   -bound, bound)           # PyTorch (out, in)
    bias_raw = jax.random.uniform(kb, (output_size,), jnp.float32, -bound, bound)
    weight_t, bias = prepare_emb_linear_params(weight_pt, bias_raw)

    x = jax.random.normal(kx, (batch, seq, input_size), jnp.float32)
    # Container of embedding tensors, like the batched input_.apply sees.
    embs = {"question": x, "column": x[:, :4], "table": x[:, :2]}

    out = emb_linear_forward(embs, weight_t, bias)
    jax.block_until_ready(out)
    for name, o in out.items():
        ref = embs[name] @ weight_pt.T + bias_raw
        assert o.shape == ref.shape
        assert jnp.allclose(o, ref, atol=1e-5, rtol=1e-5), name

    # Larger ragged case: exercises multi-block grid + partial edge tiles
    # (no jnp.pad of x / W along N / Nout).
    N2, K2, Nout2 = 600, 96, 384
    x2 = jax.random.normal(kx2, (N2, K2), jnp.float32)
    w2 = jax.random.normal(kw, (K2, Nout2), jnp.float32) * 0.05
    b2 = jax.random.normal(kb, (Nout2,), jnp.float32) * 0.05
    y2 = emb_linear(x2, w2, b2)
    jax.block_until_ready(y2)
    y2_ref = x2 @ w2 + b2
    assert jnp.allclose(y2, y2_ref, atol=1e-3, rtol=1e-3)

    print("KERNEL_OK")
</pallas_src>

<mosaic_0001>
module attributes {stable_mosaic.version = 11 : i64} {
  func.func @_emb_linear_kernel(%arg0: i32, %arg1: i32, %arg2: i32, %arg3: memref<8x32xf32, #tpu.memory_space<vmem>>, %arg4: memref<32x32xf32, #tpu.memory_space<vmem>>, %arg5: memref<1x32xf32, #tpu.memory_space<vmem>>, %arg6: memref<8x32xf32, #tpu.memory_space<vmem>>, %arg7: memref<8x32xf32, #tpu.memory_space<vmem>>) attributes {dimension_semantics = [#tpu.dimension_semantics<parallel>, #tpu.dimension_semantics<parallel>, #tpu.dimension_semantics<arbitrary>], iteration_bounds = array<i64: 1, 1, 1>, scalar_prefetch = 0 : i64, scratch_operands = 1 : i64, tpu.core_type = #tpu.core_type<tc>, window_params = [{transform_indices = @transform_0, window_bounds = array<i64: 8, 32>}, {transform_indices = @transform_1, window_bounds = array<i64: 32, 32>}, {transform_indices = @transform_2, window_bounds = array<i64: 1, 32>}, {transform_indices = @transform_3, window_bounds = array<i64: 8, 32>}]} {
    %c0_i32 = arith.constant 0 : i32
    %0 = arith.cmpi eq, %arg2, %c0_i32 : i32
    %1 = arith.extui %0 : i1 to i32
    %c0_i32_0 = arith.constant 0 : i32
    %2 = arith.cmpi ne, %1, %c0_i32_0 : i32
    scf.if %2 {
      %c0_10 = arith.constant 0 : index
      %c0_11 = arith.constant 0 : index
      %12 = vector.load %arg5[%c0_10, %c0_11] : memref<1x32xf32, #tpu.memory_space<vmem>>, vector<1x32xf32>
      %13 = vector.shape_cast %12 : vector<1x32xf32> to vector<1x32xf32>
      %14 = vector.broadcast %13 : vector<1x32xf32> to vector<8x32xf32>
      %c0_12 = arith.constant 0 : index
      %c0_13 = arith.constant 0 : index
      %15 = vector.load %arg7[%c0_12, %c0_13] : memref<8x32xf32, #tpu.memory_space<vmem>>, vector<8x32xf32>
      tpu.vector_store %arg7[%c0_12, %c0_13], %14 {strides = array<i32>} : memref<8x32xf32, #tpu.memory_space<vmem>>, vector<8x32xf32>,
    } else {
    }
    %c0 = arith.constant 0 : index
    %c0_1 = arith.constant 0 : index
    %3 = vector.load %arg7[%c0, %c0_1] : memref<8x32xf32, #tpu.memory_space<vmem>>, vector<8x32xf32>
    %c0_2 = arith.constant 0 : index
    %c0_3 = arith.constant 0 : index
    %4 = vector.load %arg3[%c0_2, %c0_3] : memref<8x32xf32, #tpu.memory_space<vmem>>, vector<8x32xf32>
    %c0_4 = arith.constant 0 : index
    %c0_5 = arith.constant 0 : index
    %5 = vector.load %arg4[%c0_4, %c0_5] : memref<32x32xf32, #tpu.memory_space<vmem>>, vector<32x32xf32>
    %cst = arith.constant dense<0.000000e+00> : vector<8x32xf32>
    %6 = tpu.matmul %4, %5, %cst {dimension_numbers = #tpu.dot_dimension_numbers<[1], [0], [0], [1], [0, 0, 1, 1], [], []>} : vector<8x32xf32>, vector<32x32xf32>, vector<8x32xf32> -> vector<8x32xf32>
    %7 = arith.addf %3, %6 : vector<8x32xf32>
    %c0_6 = arith.constant 0 : index
    %c0_7 = arith.constant 0 : index
    %8 = vector.load %arg7[%c0_6, %c0_7] : memref<8x32xf32, #tpu.memory_space<vmem>>, vector<8x32xf32>
    tpu.vector_store %arg7[%c0_6, %c0_7], %7 {strides = array<i32>} : memref<8x32xf32, #tpu.memory_space<vmem>>, vector<8x32xf32>,
    %c0_i32_8 = arith.constant 0 : i32
    %9 = arith.cmpi eq, %arg2, %c0_i32_8 : i32
    %10 = arith.extui %9 : i1 to i32
    %c0_i32_9 = arith.constant 0 : i32
    %11 = arith.cmpi ne, %10, %c0_i32_9 : i32
    scf.if %11 {
      %c0_10 = arith.constant 0 : index
      %c0_11 = arith.constant 0 : index
      %12 = vector.load %arg7[%c0_10, %c0_11] : memref<8x32xf32, #tpu.memory_space<vmem>>, vector<8x32xf32>
      %c0_12 = arith.constant 0 : index
      %c0_13 = arith.constant 0 : index
      %13 = vector.load %arg6[%c0_12, %c0_13] : memref<8x32xf32, #tpu.memory_space<vmem>>, vector<8x32xf32>
      tpu.vector_store %arg6[%c0_12, %c0_13], %12 {strides = array<i32>} : memref<8x32xf32, #tpu.memory_space<vmem>>, vector<8x32xf32>,
    } else {
    }
    return
  }
  func.func @transform_0(%arg0: i32, %arg1: i32, %arg2: i32) -> (i32, i32) {
    %c0_i32 = arith.constant 0 : i32
    return %arg0, %arg2 : i32, i32
  }
  func.func @transform_1(%arg0: i32, %arg1: i32, %arg2: i32) -> (i32, i32) {
    %c0_i32 = arith.constant 0 : i32
    return %arg2, %arg1 : i32, i32
  }
  func.func @transform_2(%arg0: i32, %arg1: i32, %arg2: i32) -> (i32, i32) {
    %c0_i32 = arith.constant 0 : i32
    %c0_i32_0 = arith.constant 0 : i32
    return %c0_i32, %arg1 : i32, i32
  }
  func.func @transform_3(%arg0: i32, %arg1: i32, %arg2: i32) -> (i32, i32) {
    %c0_i32 = arith.constant 0 : i32
    return %arg0, %arg1 : i32, i32
  }
}

</mosaic_0001>

<bundles_post_ra>
// kernel: tpu_custom_call.1
= control target key start
LH: loop header
LB: loop body
LE: loop exit
PB: predicated region body
PF: predicated region fallthrough
CT: control target
= control target key end

     0   :  { %8 = vsyncpa [#allocation4], 0  ;;  %s339_s0 = inlined_call_operand.hbm [shape: f32[8,32], index: 0, kind: input, shape index: {}]   ;;  %s340_s1 = inlined_call_operand.hbm [shape: f32[32,32], index: 1, kind: input, shape index: {}]   ;;  %s341_s2 = inlined_call_operand.vmem [shape: f32[1,32], index: 2, kind: input, shape index: {}]   ;;  %s342_s3 = inlined_call_operand.hbm [shape: f32[8,32], index: 3, kind: output, shape index: {}]  }
   0x1   :  { %9 = vsyncpa [#allocation7], 0 }
   0x2   :  { %10 = vsyncpa [#allocation5], 0  ;;  %s261_s12 = smov [#allocation3]   ;;  %s262_s14 = smov [#allocation6]  }
   0x3   :  { %s17_s13 = sshll.u32 %s261_s12, 4  ;;  %s26_s15 = sshll.u32 %s262_s14, 4  ;;  %s18_s13 = int_to_ptr.vmem [resolvable:$true] %s17_s13  ;;  %s289_s15 = int_to_ptr.vmem [resolvable:$true] %s26_s15 }
   0x4   :  { %s189_s18 = scalar_lea.hbm %s339_s0, 128 }
   0x5   :  { %p190_p0 = scmp.ne.s32.totalorder %s339_s0, %s189_s18  ;;  %p193_p1 = scmp.lt.u32.totalorder %s189_s18, %s339_s0 }
   0x7   :  { %p195_p2 = pnand %p193_p1, %p190_p0 }
   0x9   :  { %198 = shalt.err (!%p195_p2)
}
   0xa   :  { %s199_s23 = scalar_lea.vmem %s18_s13, 128  ;;  %p204_p4 = scmp.lt.s32.totalorder %s18_s13, %s18_s13 }
   0xb   :  { %p200_p3 = scmp.ne.s32.totalorder %s18_s13, %s199_s23  ;;  %p205_p5 = scmp.lt.s32.totalorder %s199_s23, %s199_s23 }
   0xd   :  { %p206_p6 = por %p205_p5, %p204_p4 }
   0xf   :  { %p207_p7 = pnand %p206_p6, %p200_p3 }
  0x11   :  { %210 = shalt.err (!%p207_p7)
}
  0x12   :  { %20 = dma.hbm_to_vmem [thread:$0]  %s339_s0, 128, %s18_s13, [#allocation4]  }
  0x13   :  { %s211_s28 = scalar_lea.hbm %s340_s1, 512 }
  0x14   :  { %p212_p8 = scmp.ne.s32.totalorder %s340_s1, %s211_s28  ;;  %p215_p9 = scmp.lt.u32.totalorder %s211_s28, %s340_s1 }
  0x16   :  { %p217_p10 = pnand %p215_p9, %p212_p8 }
  0x18   :  { %220 = shalt.err (!%p217_p10)
}
  0x19   :  { %s221_s6 = scalar_lea.vmem %s289_s15, 512  ;;  %p226_p12 = scmp.lt.s32.totalorder %s289_s15, %s289_s15 }
  0x1a   :  { %p222_p11 = scmp.ne.s32.totalorder %s289_s15, %s221_s6  ;;  %p227_p13 = scmp.lt.s32.totalorder %s221_s6, %s221_s6 }
  0x1c   :  { %p228_p0 = por %p227_p13, %p226_p12 }
  0x1e   :  { %p229_p1 = pnand %p228_p0, %p222_p11 }
  0x20   :  { %232 = shalt.err (!%p229_p1)
}
  0x21   :  { %s263_s0 = smov 128   ;;  %s264_s7 = smov 8  }
  0x22   :  { %32 = dma.hbm_to_vmem [thread:$0]  %s340_s1, 512, %s289_s15, [#allocation7], %s263_s0, %s263_s0, %s264_s7  }
  0x23   :  { %255 = dma.done.wait [#allocation4], 128  }
  0x24   :  { %256 = vsyncadd [#allocation4], 4294967168 }
  0x25   :  { %257 = dma.done.wait [#allocation7], 512  }
  0x26   :  { %258 = vsyncadd [#allocation7], 4294966784  ;;  %v265_v0 = vmov 0.0|0.0   ;;  %vm266_vm0 = vmmov 0   ;;  %v267_v1 = vmov 0.0   ;;  %v56_v2 = vld [vmem:[#allocation6] sm:$0xff] }
  0x27   :  { %175 = vmatprep.subr.bf16.mxu0 %v265_v0  ;;  %172 = vmatprep.mubr.msk.f32.mxu0 %vm266_vm0, %v267_v1  ;;  %v57_v3 = vld [vmem:[#allocation6 + $0x8] sm:$0xff]  ;;  %v58_v4 = vld [vmem:[#allocation6 + $0x10] sm:$0xff]  ;;  %v59_v6 = vld [vmem:[#allocation6 + $0x18] sm:$0xff]  ;;  %vm52_vm1 = vcmask 261120   ;;  %s268_s1 = smov [#allocation8]  }
  0x28   :  { %v176_v5 = vpack.c.bf16 %v57_v3, %v56_v2  ;;  %v157_v7 = vld [vmem:[%s341_s2] ss:$0 sm:$0xff]  ;;  %v179_v8 = vpack.c.bf16 %v59_v6, %v58_v4  ;;  %v55_v9 = vld [vmem:[#allocation3] sm:$0xff]  ;;  %s147_s12 = sshll.u32 %s268_s1, 4  ;;  %s148_s12 = int_to_ptr.vmem [resolvable:$true] %s147_s12 }
  0x29   :  { %53 = vst.msk [vmem:[#allocation2] sm:$0xff] %vm52_vm1, %v157_v7  ;;  %s233_s2 = scalar_lea.vmem %s148_s12, 128  ;;  %p238_p3 = scmp.lt.s32.totalorder %s148_s12, %s148_s12 }
  0x2a   :  { %177 = vmatpush3.bf16.msra.mxu0 %v176_v5  ;;  %p234_p2 = scmp.ne.s32.totalorder %s148_s12, %s233_s2  ;;  %p239_p4 = scmp.lt.s32.totalorder %s233_s2, %s233_s2 }
  0x2b   :  { %178 = vmatprep.subr.bf16.mxu0 %v265_v0 }
  0x2c   :  { %p240_p5 = por %p239_p4, %p238_p3 }
  0x2e   :  { %180 = vmatpush3.bf16.msra.mxu0 %v179_v8  ;;  %p241_p6 = pnand %p240_p5, %p234_p2 }
  0x30   :  { %v54_v10 = vld [vmem:[#allocation2] sm:$0xff] }
  0x31   :  { %173 = vmatmul.mubr.msk.f32.vlgmr.msra.gmra.mrb[0].mxu0 %vm52_vm1, %v55_v9 }
 0x104   :  { %v130_v11 = vpop.f32.mrb[0].mxu0 }
 0x105   :  { %v134_v12 = vadd.f32 %v130_v11, %v54_v10  ;;  %v174_v13 = vpop.f32.mrb[1].mxu0 }
 0x107   :  { %135 = vst.msk [vmem:[#allocation2] sm:$0xff] %vm52_vm1, %v134_v12 }
 0x10e   :  { %v139_v14 = vld [vmem:[#allocation2] sm:$0xff] }
 0x10f   :  { %140 = vst.msk [vmem:[#allocation8] sm:$0xff] %vm52_vm1, %v139_v14 }
 0x110   :  { %244 = shalt.err (!%p241_p6)
}
 0x111   :  { %s245_s15 = scalar_lea.hbm %s342_s3, 128 }
 0x112   :  { %p246_p7 = scmp.ne.s32.totalorder %s342_s3, %s245_s15  ;;  %p249_p8 = scmp.lt.u32.totalorder %s245_s15, %s342_s3 }
 0x114   :  { %p251_p9 = pnand %p249_p8, %p246_p7 }
 0x116   :  { %254 = shalt.err (!%p251_p9)
}
 0x117   :  { %150 = dma.vmem_to_hbm [thread:$0]  %s148_s12, 128, %s342_s3, [#allocation5]  }
 0x118   :  { %259 = dma.done.wait [#allocation5], 128  }
 0x119   :  { %260 = vsyncadd [#allocation5], 4294967168 }
 0x11a   :  { %154 = vsyncpa [#allocation4], 1 }
 0x11b   :  { %155 = vsyncpa [#allocation7], 1 }
 0x11c   :  { %156 = vsyncpa [#allocation5], 1 }

</bundles_post_ra>
